<compile_context>
chip_gen: v5e
topology: v5e:2x2
jax: 0.10.0
libtpu: 0.0.40
codegen_flags: <defaults>
</compile_context>

<pallas_src>
import numpy as np
import jax
import jax.numpy as jnp
from jax.experimental import pallas as pl
from jax.experimental.pallas import tpu as pltpu

EPS = float(np.finfo(np.float32).eps)

# ------------------------- config -------------------------
B = 2            # batch
N = 16           # max nodes per graph
K = 8            # num_sample_neighbors
E = 2            # num_bond_type  -> E+1 edge "types"
NUM_ATOM = 10
INPUT_DIM = 16
HIDDEN_DIM = [32, 32]     # num_layer = 2  -> exactly 1 message-passing layer
OUTPUT_DIM = 8
DIM_LIST = [INPUT_DIM] + HIDDEN_DIM + [OUTPUT_DIM]
assert len(HIDDEN_DIM) == 2, "fused kernel is specialized for one propagation layer"


# ------------------------- fused kernel -------------------------
def _fused_forward_kernel(s_ref, a_ref, blk_ref, m_ref, w0_ref, b0_ref,
                          wro_ref, bro_ref, out_ref):
    """Entire GraphSAGE forward (one prop layer + readout) for the whole batch.

    s_ref:   (B*N, Din)            embedded node states (flattened over batch)
    a_ref:   (B*N, B*(E+1)*N)      batch-block-diag wide aggregation matrix
                                   a[b*N+n, b*(E+1)*N + j*N + m] = mean_k [nn_idx==m]
    blk_ref: (B*(E+1)*N, (E+1)*Din) 0/1 block-diag selection mask (shape-only constant)
    m_ref:   (B*N, 1)              nonempty_mask (rows)
    w0_ref:  ((E+1)*Din, H), b0_ref: (1, H)        layer Linear
    wro_ref: (H, P+1), bro_ref: (1, P+1)           [filter_last | att] merged Linear
    out_ref: (B, P)                graph scores
    """
    E1 = E + 1
    S = s_ref[...]                                                # (B*N, Din)

    # ---- propagation layer, merged over edge types and batch ----
    # Replicate each graph's state E+1 times along rows: row order (b, j, m).
    reps = []
    for b in range(B):
        sb = S[b * N:(b + 1) * N, :]
        reps += [sb] * E1
    s_rep = jnp.concatenate(reps, axis=0)                         # (B*E1*N, Din)
    # Block-diagonal layout so each row block j only hits weight block W_j.
    s_blk = jnp.concatenate([s_rep] * E1, axis=1) * blk_ref[...]  # (B*E1*N, E1*Din)
    # R[(b,j,m), :] = state_b[m] @ W_j        -- one MXU op, 48-deep contraction
    r = jnp.dot(s_blk, w0_ref[...], preferred_element_type=jnp.float32)
    # h[(b,n), :] = sum_{j,m} adj[b,j,n,m] * state_b[m] @ W_j  == cat(msgs) @ W
    h = jnp.dot(a_ref[...], r, preferred_element_type=jnp.float32)   # (B*N, H)
    # row mask (0/1) commutes past W; bias added after masking (matches torch)
    h = jnp.maximum(m_ref[...] * h + b0_ref[...], 0.0)               # ReLU
    norm = jnp.sqrt(jnp.sum(h * h, axis=-1, keepdims=True))
    h = h * pl.reciprocal(norm + EPS, approx=False)                  # row L2 normalize
    # TODO(synk): dropout is identity here (eval mode / dropout=0.0), so not emitted.

    # ---- readout: projection + attention logit from ONE matmul ----
    y_all = jnp.dot(h, wro_ref[...], preferred_element_type=jnp.float32) + bro_ref[...]
    y = y_all[:, :OUTPUT_DIM]                                        # (B*N, P)
    att = jax.nn.sigmoid(y_all[:, OUTPUT_DIM:OUTPUT_DIM + 1])        # (B*N, 1)
    contrib = att * y                                                # (B*N, P)

    # per-graph mean over nodes (mask=None path of the torch module)
    means = [jnp.mean(contrib[b * N:(b + 1) * N, :], axis=0, keepdims=True)
             for b in range(B)]
    out_ref[...] = jnp.concatenate(means, axis=0)                    # (B, P)


# ------------------------- wrapper -------------------------
def graph_sage_forward(params, node_feat, nn_idx, nonempty_mask):
    """Full forward (label=None, mask=None path): returns score (B, P)."""
    E1 = E + 1

    # Embedding lookup (glue; integer gather stays in JAX).
    state = jnp.take(params["embedding"], node_feat, axis=0)            # (B, N, Din)
    s_all = state.reshape(B * N, INPUT_DIM)

    # Mean-over-K neighbor aggregation as a batch-block-diag wide matrix (glue).
    onehot = jax.nn.one_hot(nn_idx, N, dtype=jnp.float32)               # (B, N, K, E1, N)
    a_blocks = onehot.mean(axis=2).reshape(B, N, E1 * N)                # [b, n, j*N+m]
    a_big = jnp.zeros((B * N, B * E1 * N), jnp.float32)
    for b in range(B):
        a_big = a_big.at[b * N:(b + 1) * N,
                         b * E1 * N:(b + 1) * E1 * N].set(a_blocks[b])

    # Shape-only block-diagonal selection mask for the in-kernel state replication.
    row_j = (jnp.arange(B * E1 * N) % (E1 * N)) // N
    col_j = jnp.arange(E1 * INPUT_DIM) // INPUT_DIM
    blkmask = (row_j[:, None] == col_j[None, :]).astype(jnp.float32)    # (B*E1*N, E1*Din)

    nmask = nonempty_mask.reshape(B * N, 1).astype(jnp.float32)

    # Merge readout projection and attention into one weight matrix.
    w_ro = jnp.concatenate([params["filter_w_last"], params["att_w"]], axis=1)  # (H, P+1)
    b_ro = jnp.concatenate([params["filter_b_last"], params["att_b"]], axis=1)  # (1, P+1)

    operands = (s_all, a_big, blkmask, nmask,
                params["filter_w_0"], params["filter_b_0"], w_ro, b_ro)

    def full_spec(shape):
        nd = len(shape)
        return pl.BlockSpec(shape, lambda i: (0,) * nd)

    return pl.pallas_call(
        _fused_forward_kernel,
        out_shape=jax.ShapeDtypeStruct((B, OUTPUT_DIM), jnp.float32),
        grid_spec=pltpu.PrefetchScalarGridSpec(
            num_scalar_prefetch=0,
            grid=(1,),                                  # single fused invocation
            in_specs=[full_spec(x.shape) for x in operands],
            out_specs=pl.BlockSpec((B, OUTPUT_DIM), lambda i: (0, 0)),
        ),
        compiler_params=pltpu.CompilerParams(dimension_semantics=("arbitrary",)),
    )(*operands)


# ------------------------- deterministic params -------------------------
def _xavier(key, fan_in, fan_out):
    lim = float(np.sqrt(6.0 / (fan_in + fan_out)))
    return jax.random.uniform(key, (fan_in, fan_out), jnp.float32, -lim, lim)


def init_params(key):
    keys = jax.random.split(key, 8)
    params = {"embedding": jax.random.normal(keys[0], (NUM_ATOM, INPUT_DIM), jnp.float32)}
    # filter[0]: Linear(D0*(E+1) -> H1)   (only prop layer used, num_layer-1 = 1)
    params["filter_w_0"] = _xavier(keys[1], INPUT_DIM * (E + 1), HIDDEN_DIM[0])
    params["filter_b_0"] = jnp.zeros((1, HIDDEN_DIM[0]), jnp.float32)
    # filter[-1]: Linear(hidden[-1] -> output_dim)
    params["filter_w_last"] = _xavier(keys[2], DIM_LIST[-2], DIM_LIST[-1])
    params["filter_b_last"] = jnp.zeros((1, DIM_LIST[-1]), jnp.float32)
    # att_func: Linear(hidden[-1] -> 1) + Sigmoid
    params["att_w"] = _xavier(keys[3], DIM_LIST[-2], 1)
    params["att_b"] = jnp.zeros((1, 1), jnp.float32)
    return params


# ------------------------- pure-JAX reference -------------------------
def reference_forward(params, node_feat, nn_idx, nonempty_mask):
    state = jnp.take(params["embedding"], node_feat, axis=0)
    num_layer = len(HIDDEN_DIM)
    for ii in range(num_layer - 1):
        msgs = []
        for j in range(E + 1):
            idx = nn_idx[:, :, :, j]                                       # (B, N, K)
            nn_state = jax.vmap(lambda s, i: s[i])(state, idx)             # (B, N, K, D)
            agg = nn_state.mean(axis=2)
            msgs.append(agg * nonempty_mask)
        cat = jnp.concatenate(msgs, axis=-1)
        h = jnp.maximum(cat @ params[f"filter_w_{ii}"] + params[f"filter_b_{ii}"][0], 0.0)
        nrm = jnp.linalg.norm(h, axis=-1, keepdims=True)
        state = h / (nrm + EPS)
    y = state @ params["filter_w_last"] + params["filter_b_last"][0]       # (B, N, P)
    att = jax.nn.sigmoid(state @ params["att_w"] + params["att_b"][0])     # (B, N, 1)
    return (att * y).mean(axis=1)                                          # (B, P)


# ------------------------- main -------------------------
if __name__ == "__main__":
    key = jax.random.PRNGKey(0)
    kp, k1, k2, k3 = jax.random.split(key, 4)
    params = init_params(kp)

    node_feat = jax.random.randint(k1, (B, N), 0, NUM_ATOM, dtype=jnp.int32)
    nn_idx = jax.random.randint(k2, (B, N, K, E + 1), 0, N, dtype=jnp.int32)
    # a few "empty" nodes per graph get mask 0
    nonempty_mask = (jnp.arange(N)[None, :, None] < jnp.array([N, N - 3])[:, None, None]
                     ).astype(jnp.float32)                                 # (B, N, 1)

    score = graph_sage_forward(params, node_feat, nn_idx, nonempty_mask)
    score = jax.block_until_ready(score)

    ref = jax.block_until_ready(reference_forward(params, node_feat, nn_idx, nonempty_mask))
    np.testing.assert_allclose(np.asarray(score), np.asarray(ref), rtol=1e-5, atol=1e-5)

    print("KERNEL_OK")
</pallas_src>

<mosaic_0001>
module attributes {stable_mosaic.version = 11 : i64} {
  func.func @_fused_forward_kernel(%arg0: i32, %arg1: memref<32x16xf32, #tpu.memory_space<vmem>>, %arg2: memref<32x96xf32, #tpu.memory_space<vmem>>, %arg3: memref<96x48xf32, #tpu.memory_space<vmem>>, %arg4: memref<32x1xf32, #tpu.memory_space<vmem>>, %arg5: memref<48x32xf32, #tpu.memory_space<vmem>>, %arg6: memref<1x32xf32, #tpu.memory_space<vmem>>, %arg7: memref<32x9xf32, #tpu.memory_space<vmem>>, %arg8: memref<1x9xf32, #tpu.memory_space<vmem>>, %arg9: memref<2x8xf32, #tpu.memory_space<vmem>>) attributes {dimension_semantics = [#tpu.dimension_semantics<arbitrary>], iteration_bounds = array<i64: 1>, scalar_prefetch = 0 : i64, scratch_operands = 0 : i64, tpu.core_type = #tpu.core_type<tc>, window_params = [{pipeline_mode = #tpu.pipeline_mode<synchronous>, transform_indices = @transform_0, window_bounds = array<i64: 32, 16>}, {pipeline_mode = #tpu.pipeline_mode<synchronous>, transform_indices = @transform_1, window_bounds = array<i64: 32, 96>}, {pipeline_mode = #tpu.pipeline_mode<synchronous>, transform_indices = @transform_2, window_bounds = array<i64: 96, 48>}, {pipeline_mode = #tpu.pipeline_mode<synchronous>, transform_indices = @transform_3, window_bounds = array<i64: 32, 1>}, {pipeline_mode = #tpu.pipeline_mode<synchronous>, transform_indices = @transform_4, window_bounds = array<i64: 48, 32>}, {pipeline_mode = #tpu.pipeline_mode<synchronous>, transform_indices = @transform_5, window_bounds = array<i64: 1, 32>}, {pipeline_mode = #tpu.pipeline_mode<synchronous>, transform_indices = @transform_6, window_bounds = array<i64: 32, 9>}, {pipeline_mode = #tpu.pipeline_mode<synchronous>, transform_indices = @transform_7, window_bounds = array<i64: 1, 9>}, {pipeline_mode = #tpu.pipeline_mode<synchronous>, transform_indices = @transform_8, window_bounds = array<i64: 2, 8>}]} {
    %c0 = arith.constant 0 : index
    %c0_0 = arith.constant 0 : index
    %0 = vector.load %arg1[%c0, %c0_0] : memref<32x16xf32, #tpu.memory_space<vmem>>, vector<32x16xf32>
    %1 = vector.extract_strided_slice %0 {offsets = [0, 0], sizes = [16, 16], strides = [1, 1]} : vector<32x16xf32> to vector<16x16xf32>
    %2 = vector.extract_strided_slice %0 {offsets = [16, 0], sizes = [16, 16], strides = [1, 1]} : vector<32x16xf32> to vector<16x16xf32>
    %3 = tpu.concatenate %1, %1, %1, %2, %2, %2 in 0 : vector<16x16xf32>, vector<16x16xf32>, vector<16x16xf32>, vector<16x16xf32>, vector<16x16xf32>, vector<16x16xf32> -> vector<96x16xf32>
    %4 = tpu.concatenate %3, %3, %3 in 1 : vector<96x16xf32>, vector<96x16xf32>, vector<96x16xf32> -> vector<96x48xf32>
    %c0_1 = arith.constant 0 : index
    %c0_2 = arith.constant 0 : index
    %5 = vector.load %arg3[%c0_1, %c0_2] : memref<96x48xf32, #tpu.memory_space<vmem>>, vector<96x48xf32>
    %6 = arith.mulf %4, %5 : vector<96x48xf32>
    %c0_3 = arith.constant 0 : index
    %c0_4 = arith.constant 0 : index
    %7 = vector.load %arg5[%c0_3, %c0_4] : memref<48x32xf32, #tpu.memory_space<vmem>>, vector<48x32xf32>
    %cst = arith.constant dense<0.000000e+00> : vector<96x32xf32>
    %8 = tpu.matmul %6, %7, %cst {dimension_numbers = #tpu.dot_dimension_numbers<[1], [0], [0], [1], [0, 0, 1, 1], [], []>} : vector<96x48xf32>, vector<48x32xf32>, vector<96x32xf32> -> vector<96x32xf32>
    %c0_5 = arith.constant 0 : index
    %c0_6 = arith.constant 0 : index
    %9 = vector.load %arg2[%c0_5, %c0_6] : memref<32x96xf32, #tpu.memory_space<vmem>>, vector<32x96xf32>
    %cst_7 = arith.constant dense<0.000000e+00> : vector<32x32xf32>
    %10 = tpu.matmul %9, %8, %cst_7 {dimension_numbers = #tpu.dot_dimension_numbers<[1], [0], [0], [1], [0, 0, 1, 1], [], []>} : vector<32x96xf32>, vector<96x32xf32>, vector<32x32xf32> -> vector<32x32xf32>
    %c0_8 = arith.constant 0 : index
    %c0_9 = arith.constant 0 : index
    %11 = vector.load %arg4[%c0_8, %c0_9] : memref<32x1xf32, #tpu.memory_space<vmem>>, vector<32x1xf32>
    %12 = vector.broadcast %11 : vector<32x1xf32> to vector<32x32xf32>
    %13 = arith.mulf %12, %10 : vector<32x32xf32>
    %c0_10 = arith.constant 0 : index
    %c0_11 = arith.constant 0 : index
    %14 = vector.load %arg6[%c0_10, %c0_11] : memref<1x32xf32, #tpu.memory_space<vmem>>, vector<1x32xf32>
    %15 = vector.broadcast %14 : vector<1x32xf32> to vector<32x32xf32>
    %16 = arith.addf %13, %15 : vector<32x32xf32>
    %cst_12 = arith.constant 0.000000e+00 : f32
    %17 = vector.broadcast %cst_12 : f32 to vector<32x32xf32>
    %18 = arith.maximumf %16, %17 : vector<32x32xf32>
    %19 = arith.mulf %18, %18 : vector<32x32xf32>
    %cst_13 = arith.constant dense<0.000000e+00> : vector<32xf32>
    %20 = vector.multi_reduction <add>, %19, %cst_13 [1] : vector<32x32xf32> to vector<32xf32>
    %21 = vector.shape_cast %20 : vector<32xf32> to vector<32x1xf32>
    %22 = math.sqrt %21 : vector<32x1xf32>
    %cst_14 = arith.constant 1.1920929E-7 : f32
    %23 = vector.broadcast %cst_14 : f32 to vector<32x1xf32>
    %24 = arith.addf %22, %23 : vector<32x1xf32>
    %25 = tpu.reciprocal %24 : vector<32x1xf32> -> vector<32x1xf32>
    %26 = vector.broadcast %25 : vector<32x1xf32> to vector<32x32xf32>
    %27 = arith.mulf %18, %26 : vector<32x32xf32>
    %c0_15 = arith.constant 0 : index
    %c0_16 = arith.constant 0 : index
    %28 = vector.load %arg7[%c0_15, %c0_16] : memref<32x9xf32, #tpu.memory_space<vmem>>, vector<32x9xf32>
    %cst_17 = arith.constant dense<0.000000e+00> : vector<32x9xf32>
    %29 = tpu.matmul %27, %28, %cst_17 {dimension_numbers = #tpu.dot_dimension_numbers<[1], [0], [0], [1], [0, 0, 1, 1], [], []>} : vector<32x32xf32>, vector<32x9xf32>, vector<32x9xf32> -> vector<32x9xf32>
    %c0_18 = arith.constant 0 : index
    %c0_19 = arith.constant 0 : index
    %30 = vector.load %arg8[%c0_18, %c0_19] : memref<1x9xf32, #tpu.memory_space<vmem>>, vector<1x9xf32>
    %31 = vector.broadcast %30 : vector<1x9xf32> to vector<32x9xf32>
    %32 = arith.addf %29, %31 : vector<32x9xf32>
    %33 = vector.extract_strided_slice %32 {offsets = [0, 0], sizes = [32, 8], strides = [1, 1]} : vector<32x9xf32> to vector<32x8xf32>
    %34 = vector.extract_strided_slice %32 {offsets = [0, 8], sizes = [32, 1], strides = [1, 1]} : vector<32x9xf32> to vector<32x1xf32>
    %35 = arith.negf %34 : vector<32x1xf32>
    %36 = math.exp %35 : vector<32x1xf32>
    %cst_20 = arith.constant 1.000000e+00 : f32
    %37 = vector.broadcast %cst_20 : f32 to vector<32x1xf32>
    %38 = arith.addf %37, %36 : vector<32x1xf32>
    %39 = arith.divf %37, %38 : vector<32x1xf32>
    %40 = vector.broadcast %39 : vector<32x1xf32> to vector<32x8xf32>
    %41 = arith.mulf %40, %33 : vector<32x8xf32>
    %42 = vector.extract_strided_slice %41 {offsets = [0, 0], sizes = [16, 8], strides = [1, 1]} : vector<32x8xf32> to vector<16x8xf32>
    %cst_21 = arith.constant dense<0.000000e+00> : vector<8xf32>
    %43 = vector.multi_reduction <add>, %42, %cst_21 [0] : vector<16x8xf32> to vector<8xf32>
    %44 = vector.shape_cast %43 : vector<8xf32> to vector<1x8xf32>
    %cst_22 = arith.constant 1.600000e+01 : f32
    %45 = vector.broadcast %cst_22 : f32 to vector<1x8xf32>
    %46 = arith.divf %44, %45 : vector<1x8xf32>
    %47 = vector.extract_strided_slice %41 {offsets = [16, 0], sizes = [16, 8], strides = [1, 1]} : vector<32x8xf32> to vector<16x8xf32>
    %cst_23 = arith.constant dense<0.000000e+00> : vector<8xf32>
    %48 = vector.multi_reduction <add>, %47, %cst_23 [0] : vector<16x8xf32> to vector<8xf32>
    %49 = vector.shape_cast %48 : vector<8xf32> to vector<1x8xf32>
    %cst_24 = arith.constant 1.600000e+01 : f32
    %50 = vector.broadcast %cst_24 : f32 to vector<1x8xf32>
    %51 = arith.divf %49, %50 : vector<1x8xf32>
    %52 = tpu.concatenate %46, %51 in 0 : vector<1x8xf32>, vector<1x8xf32> -> vector<2x8xf32>
    %c0_25 = arith.constant 0 : index
    %c0_26 = arith.constant 0 : index
    %53 = vector.load %arg9[%c0_25, %c0_26] : memref<2x8xf32, #tpu.memory_space<vmem>>, vector<2x8xf32>
    tpu.vector_store %arg9[%c0_25, %c0_26], %52 {strides = array<i32>} : memref<2x8xf32, #tpu.memory_space<vmem>>, vector<2x8xf32>,
    return
  }
  func.func @transform_0(%arg0: i32) -> (i32, i32) {
    %c0_i32 = arith.constant 0 : i32
    %c0_i32_0 = arith.constant 0 : i32
    %c0_i32_1 = arith.constant 0 : i32
    return %c0_i32, %c0_i32_0 : i32, i32
  }
  func.func @transform_1(%arg0: i32) -> (i32, i32) {
    %c0_i32 = arith.constant 0 : i32
    %c0_i32_0 = arith.constant 0 : i32
    %c0_i32_1 = arith.constant 0 : i32
    return %c0_i32, %c0_i32_0 : i32, i32
  }
  func.func @transform_2(%arg0: i32) -> (i32, i32) {
    %c0_i32 = arith.constant 0 : i32
    %c0_i32_0 = arith.constant 0 : i32
    %c0_i32_1 = arith.constant 0 : i32
    return %c0_i32, %c0_i32_0 : i32, i32
  }
  func.func @transform_3(%arg0: i32) -> (i32, i32) {
    %c0_i32 = arith.constant 0 : i32
    %c0_i32_0 = arith.constant 0 : i32
    %c0_i32_1 = arith.constant 0 : i32
    return %c0_i32, %c0_i32_0 : i32, i32
  }
  func.func @transform_4(%arg0: i32) -> (i32, i32) {
    %c0_i32 = arith.constant 0 : i32
    %c0_i32_0 = arith.constant 0 : i32
    %c0_i32_1 = arith.constant 0 : i32
    return %c0_i32, %c0_i32_0 : i32, i32
  }
  func.func @transform_5(%arg0: i32) -> (i32, i32) {
    %c0_i32 = arith.constant 0 : i32
    %c0_i32_0 = arith.constant 0 : i32
    %c0_i32_1 = arith.constant 0 : i32
    return %c0_i32, %c0_i32_0 : i32, i32
  }
  func.func @transform_6(%arg0: i32) -> (i32, i32) {
    %c0_i32 = arith.constant 0 : i32
    %c0_i32_0 = arith.constant 0 : i32
    %c0_i32_1 = arith.constant 0 : i32
    return %c0_i32, %c0_i32_0 : i32, i32
  }
  func.func @transform_7(%arg0: i32) -> (i32, i32) {
    %c0_i32 = arith.constant 0 : i32
    %c0_i32_0 = arith.constant 0 : i32
    %c0_i32_1 = arith.constant 0 : i32
    return %c0_i32, %c0_i32_0 : i32, i32
  }
  func.func @transform_8(%arg0: i32) -> (i32, i32) {
    %c0_i32 = arith.constant 0 : i32
    %c0_i32_0 = arith.constant 0 : i32
    %c0_i32_1 = arith.constant 0 : i32
    return %c0_i32, %c0_i32_0 : i32, i32
  }
}

</mosaic_0001>

<bundles_post_ra>
// kernel: tpu_custom_call.1
= control target key start
LH: loop header
LB: loop body
LE: loop exit
PB: predicated region body
PF: predicated region fallthrough
CT: control target
= control target key end

     0   :  { %s707_s9 = smov 16   ;;  %s937_s0 = inlined_call_operand.vmem [shape: f32[32,16], index: 0, kind: input, shape index: {}]   ;;  %s938_s1 = inlined_call_operand.vmem [shape: f32[32,96], index: 1, kind: input, shape index: {}]   ;;  %s939_s2 = inlined_call_operand.vmem [shape: f32[96,48], index: 2, kind: input, shape index: {}]   ;;  %s940_s3 = inlined_call_operand.vmem [shape: f32[32,1], index: 3, kind: input, shape index: {}]   ;;  %s941_s4 = inlined_call_operand.vmem [shape: f32[48,32], index: 4, kind: input, shape index: {}]   ;;  %s942_s5 = inlined_call_operand.vmem [shape: f32[1,32], index: 5, kind: input, shape index: {}]   ;;  %s943_s6 = inlined_call_operand.vmem [shape: f32[32,9], index: 6, kind: input, shape index: {}]   ;;  %s944_s7 = inlined_call_operand.vmem [shape: f32[1,9], index: 7, kind: input, shape index: {}]   ;;  %s945_s8 = inlined_call_operand.hbm [shape: f32[2,8], index: 8, kind: output, shape index: {}]  }
   0x1   :  { %v32_v0 = vld [vmem:[%s937_s0 + $0x10] sm:$0xff]  ;;  %v33_v1 = vld [vmem:[%s937_s0 + $0x18] sm:$0xff]  ;;  %v30_v2 = vld [vmem:[%s937_s0] sm:$0xff] }
   0x2   :  { %42 = vrot.lane.b32.xlu0 %v32_v0, %s707_s9  ;;  %44 = vrot.lane.b32.xlu1 %v33_v1, %s707_s9 }
   0x3   :  { %38 = vrot.lane.b32.xlu2 %v30_v2, %s707_s9 }
   0x4   :  { %13 = vsyncpa [#allocation3], 0  ;;  %s708_s12 = smov 32   ;;  %v31_v3 = vld [vmem:[%s937_s0 + $0x8] sm:$0xff]  ;;  %v100_v5 = vld [vmem:[%s941_s4 + $0x20] sm:$0xff]  ;;  %vm62_vm0 = vcmask 130048  }
   0x5   :  { %v101_v4 = vld [vmem:[%s941_s4 + $0x28] sm:$0xff]  ;;  %v99_v6 = vld [vmem:[%s941_s4 + $0x18] sm:$0xff]  ;;  %v98_v7 = vld [vmem:[%s941_s4 + $0x10] sm:$0xff]  ;;  %vm67_vm1 = vcmask 261120   ;;  %vm102_vm2 = vcmask 392192   ;;  %v709_v62 = vmov 0  }
   0x6   :  { %627 = vmatpush.msra.mxu3 %v101_v4  ;;  %149 = vmatpush.msra.mxu0 %v101_v4  ;;  %v97_v8 = vld [vmem:[%s941_s4 + $0x8] sm:$0xff]  ;;  %v96_v10 = vld [vmem:[%s941_s4] sm:$0xff]  ;;  %v78_v18 = vld [vmem:[%s939_s2 + $0x30] sm:$0xff]  ;;  %vm196_vm3 = vcmask 785408   ;;  %s594_s27 = sshll.u32 %s945_s8, 4  ;;  %s595_s27 = int_to_ptr.hbm [resolvable:$true] %s594_s27 }
   0x7   :  { %v72_v12 = vld [vmem:[%s939_s2] sm:$0xff]  ;;  %v79_v26 = vld [vmem:[%s939_s2 + $0x38] sm:$0xff]  ;;  %v73_v29 = vld [vmem:[%s939_s2 + $0x8] sm:$0xff]  ;;  %640 = vset.pattern.permute.xlu0 %v709_v62  ;;  %641 = vset.pattern.permute.xlu1 %v709_v62 }
   0x8   :  { %628 = vmatpush.msra.mxu3 %v100_v5  ;;  %150 = vmatpush.msra.mxu0 %v100_v5  ;;  %v80_v34 = vld [vmem:[%s939_s2 + $0x40] sm:$0xff]  ;;  %v74_v35 = vld [vmem:[%s939_s2 + $0x10] sm:$0xff]  ;;  %v75_v38 = vld [vmem:[%s939_s2 + $0x18] sm:$0xff] }
   0x9   :  { %v81_v39 = vld [vmem:[%s939_s2 + $0x48] sm:$0xff]  ;;  %v82_v42 = vld [vmem:[%s939_s2 + $0x50] sm:$0xff]  ;;  %v76_v43 = vld [vmem:[%s939_s2 + $0x20] sm:$0xff]  ;;  %639 = vset.pattern.permute.xlu2 %v709_v62 }
   0xa   :  { %54 = vrot.lane.b32.xlu0 %v32_v0, %s708_s12  ;;  %56 = vrot.lane.b32.xlu1 %v33_v1, %s708_s12  ;;  %v83_v46 = vld [vmem:[%s939_s2 + $0x58] sm:$0xff]  ;;  %v77_v47 = vld [vmem:[%s939_s2 + $0x28] sm:$0xff] }
   0xb   :  { %50 = vrot.lane.b32.xlu2 %v30_v2, %s708_s12  ;;  %629 = vmatpush.msra.mxu3 %v99_v6  ;;  %v239_v61 = vld [vmem:[%s940_s3 + $0x8] sm:$0xff]  ;;  %v194_v5 = vld [vmem:[%s938_s1 + $0x10] sm:$0xff] }
   0xc   :  { %151 = vmatpush.msra.mxu0 %v99_v6  ;;  %v193_v4 = vld [vmem:[%s938_s1 + $0x8] sm:$0xff]  ;;  %v195_v6 = vld [vmem:[%s938_s1 + $0x18] sm:$0xff] }
   0xd   :  { %630 = vmatpush.msra.mxu3 %v98_v7 }
   0xe   :  { %152 = vmatpush.msra.mxu0 %v98_v7  ;;  %v645_v7 = vld [vmem:[%s942_s5] ss:$0 sm:$0xff] }
   0xf   :  { %631 = vmatpush.msra.mxu3 %v97_v8 }
  0x10   :  { %153 = vmatpush.msra.mxu0 %v97_v8 }
  0x11   :  { %632 = vmatpush.msra.mxu3 %v96_v10 }
  0x12   :  { %40 = vrot.lane.b32.xlu0 %v31_v3, %s707_s9  ;;  %52 = vrot.lane.b32.xlu1 %v31_v3, %s708_s12 }
  0x13   :  { %154 = vmatpush.msra.mxu0 %v96_v10 }
  0x1a   :  { %249 = vperm.xlu0 %640, %v239_v61  }
  0x5d   :  { %v39_v9 = vpop.permute.xlu2 %38 }
  0x5e   :  { %v63_v11 = vsel %vm62_vm0, %v30_v2, %v39_v9  ;;  %v192_v2 = vld [vmem:[%s938_s1] sm:$0xff] }
  0x65   :  { %v51_v13 = vpop.permute.xlu2 %50 }
  0x66   :  { %v68_v14 = vsel %vm67_vm1, %v63_v11, %v51_v13 }
  0x67   :  { %v84_v15 = vmul.f32 %v72_v12, %v68_v14  ;;  %v86_v37 = vmul.f32 %v74_v35, %v68_v14  ;;  %v88_v45 = vmul.f32 %v76_v43, %v68_v14 }
  0x69   :  { %603 = vmatmul.msk.f32.vlgmr.msra.gmra.mxu0 %vm102_vm2, %v84_v15 }
  0x74   :  { %v43_v16 = vpop.permute.xlu0 %42  ;;  %v45_v17 = vpop.permute.xlu1 %44 }
  0x75   :  { %v65_v19 = vsel %vm62_vm0, %v32_v0, %v43_v16  ;;  %v66_v24 = vsel %vm62_vm0, %v33_v1, %v45_v17  ;;  %v240_v0 = vld [vmem:[%s940_s3 + $0x10] sm:$0xff]  ;;  %v238_v1 = vld [vmem:[%s940_s3] sm:$0xff] }
  0x76   :  { %254 = vperm.xlu1 %641, %v240_v0   ;;  %244 = vperm.xlu2 %639, %v238_v1  }
  0x7c   :  { %v55_v20 = vpop.permute.xlu0 %54  ;;  %v57_v21 = vpop.permute.xlu1 %56 }
  0x7d   :  { %v70_v22 = vsel %vm67_vm1, %v65_v19, %v55_v20  ;;  %v71_v25 = vsel %vm67_vm1, %v66_v24, %v57_v21 }
  0x7e   :  { %v90_v23 = vmul.f32 %v78_v18, %v70_v22  ;;  %v91_v32 = vmul.f32 %v79_v26, %v71_v25  ;;  %v92_v36 = vmul.f32 %v80_v34, %v70_v22  ;;  %v93_v41 = vmul.f32 %v81_v39, %v71_v25 }
  0x7f   :  { %v94_v44 = vmul.f32 %v82_v42, %v70_v22  ;;  %v95_v48 = vmul.f32 %v83_v46, %v71_v25  ;;  %v407_v42 = vld [vmem:[%s943_s6 + $0x8] sm:$0xff] }
  0x80   :  { %609 = vmatmul.msk.f32.vlgmr.msra.gmra.mxu3 %vm102_vm2, %v90_v23 }
  0x84   :  { %v41_v27 = vpop.permute.xlu0 %40  ;;  %v53_v28 = vpop.permute.xlu1 %52 }
  0x85   :  { %v64_v30 = vsel %vm62_vm0, %v31_v3, %v41_v27  ;;  %v241_v3 = vld [vmem:[%s940_s3 + $0x18] sm:$0xff] }
  0x86   :  { %v69_v31 = vsel %vm67_vm1, %v64_v30, %v53_v28  ;;  %259 = vperm.xlu2 %639, %v241_v3  }
  0x87   :  { %v85_v33 = vmul.f32 %v73_v29, %v69_v31  ;;  %v87_v40 = vmul.f32 %v75_v38, %v69_v31  ;;  %v89_v49 = vmul.f32 %v77_v47, %v69_v31  ;;  %v408_v38 = vld [vmem:[%s943_s6 + $0x10] sm:$0xff] }
  0x88   :  { %610 = vmatmul.msk.f32.gmra.mxu3 %vm102_vm2, %v91_v32 }
  0x89   :  { %604 = vmatmul.msk.f32.gmra.mxu0 %vm102_vm2, %v85_v33 }
  0x8c   :  { %v250_v13 = vpop.permute.xlu0 %249 }
  0x90   :  { %611 = vmatmul.msk.f32.gmra.mxu3 %vm102_vm2, %v92_v36 }
  0x91   :  { %605 = vmatmul.msk.f32.gmra.mxu0 %vm102_vm2, %v86_v37  ;;  %v409_v37 = vld [vmem:[%s943_s6 + $0x18] sm:$0xff] }
  0x92   :  { %438 = vmatpush.msra.mxu2 %v409_v37 }
  0x94   :  { %439 = vmatpush.msra.mxu2 %v408_v38 }
  0x96   :  { %440 = vmatpush.msra.mxu2 %v407_v42 }
  0x98   :  { %612 = vmatmul.msk.f32.gmra.mxu3 %vm102_vm2, %v93_v41 }
  0x99   :  { %606 = vmatmul.msk.f32.gmra.mxu0 %vm102_vm2, %v87_v40 }
  0xa0   :  { %613 = vmatmul.msk.f32.gmra.mxu3 %vm102_vm2, %v94_v44  ;;  %v406_v44 = vld [vmem:[%s943_s6] sm:$0xff] }
  0xa1   :  { %607 = vmatmul.msk.f32.gmra.mxu0 %vm102_vm2, %v88_v45  ;;  %441 = vmatpush.msra.mxu2 %v406_v44 }
  0xa8   :  { %614 = vmatmul.msk.f32.gmra.mxu3 %vm102_vm2, %v95_v48 }
  0xa9   :  { %608 = vmatmul.msk.f32.gmra.mxu0 %vm102_vm2, %v89_v49 }
  0xd0   :  { %v245_v8 = vpop.permute.xlu2 %244 }
  0xe0   :  { %v260_v28 = vpop.permute.xlu2 %259 }
  0xe6   :  { %v156_v51 = vpop.f32.mrf.mxu0 }
  0xe8   :  { %v255_v20 = vpop.permute.xlu1 %254 }
 0x103   :  { %v174_v50 = vpop.f32.mrf.mxu3 }
 0x106   :  { %v159_v53 = vpop.f32.mrf.mxu0 }
 0x10b   :  { %v177_v52 = vpop.f32.mrf.mxu3 }
 0x10e   :  { %v162_v55 = vpop.f32.mrf.mxu0 }
 0x113   :  { %v180_v54 = vpop.f32.mrf.mxu3 }
 0x116   :  { %v165_v57 = vpop.f32.mrf.mxu0 }
 0x11b   :  { %v183_v56 = vpop.f32.mrf.mxu3 }
 0x11e   :  { %v168_v60 = vpop.f32.mrf.mxu0 }
 0x123   :  { %v186_v58 = vpop.f32.mrf.mxu3 }
 0x126   :  { %v171_v63 = vpop.f32.mrf.mxu0 }
 0x12b   :  { %v189_v59 = vpop.f32.mrf.mxu3 }
 0x12c   :  { %213 = vmatpush.msra.mxu1 %v189_v59 }
 0x12e   :  { %214 = vmatpush.msra.mxu1 %v186_v58 }
 0x130   :  { %215 = vmatpush.msra.mxu1 %v183_v56 }
 0x132   :  { %216 = vmatpush.msra.mxu1 %v180_v54 }
 0x134   :  { %217 = vmatpush.msra.mxu1 %v177_v52 }
 0x136   :  { %218 = vmatpush.msra.mxu1 %v174_v50 }
 0x138   :  { %219 = vmatpush.msra.mxu1 %v171_v63 }
 0x13a   :  { %220 = vmatpush.msra.mxu1 %v168_v60 }
 0x13c   :  { %221 = vmatpush.msra.mxu1 %v165_v57 }
 0x13e   :  { %222 = vmatpush.msra.mxu1 %v162_v55 }
 0x140   :  { %223 = vmatpush.msra.mxu1 %v159_v53 }
 0x142   :  { %224 = vmatpush.msra.mxu1 %v156_v51 }
 0x143   :  { %615 = vmatmul.msk.f32.vlgmr.msra.gmra.mxu1 %vm196_vm3, %v192_v2 }
 0x14b   :  { %616 = vmatmul.msk.f32.gmra.mxu1 %vm196_vm3, %v193_v4 }
 0x153   :  { %617 = vmatmul.msk.f32.gmra.mxu1 %vm196_vm3, %v194_v5 }
 0x15b   :  { %618 = vmatmul.msk.f32.gmra.mxu1 %vm196_vm3, %v195_v6 }
 0x1c0   :  { %v226_v9 = vpop.f32.mrf.mxu1 }
 0x1c1   :  { %v262_v10 = vmul.f32 %v245_v8, %v226_v9 }
 0x1c3   :  { %v270_v11 = vadd.f32 %v645_v7, %v262_v10 }
 0x1c5   :  { %v871_v12 = vmax.f32 %v270_v11, 0.0 }
 0x1c7   :  { %v278_v14 = vmul.f32 %v871_v12, %v871_v12 }
 0x1c8   :  { %v229_v15 = vpop.f32.mrf.mxu1 }
 0x1c9   :  { %v263_v16 = vmul.f32 %v250_v13, %v229_v15  ;;  %v282_v17 = vsel %vm67_vm1, %v278_v14, 0.0 }
 0x1ca   :  { %283 = vadd.xlane.f32.xlu1 %v282_v17 }
 0x1cb   :  { %v271_v18 = vadd.f32 %v645_v7, %v263_v16 }
 0x1cd   :  { %v876_v19 = vmax.f32 %v271_v18, 0.0 }
 0x1cf   :  { %v279_v21 = vmul.f32 %v876_v19, %v876_v19 }
 0x1d0   :  { %v232_v22 = vpop.f32.mrf.mxu1 }
 0x1d1   :  { %v264_v23 = vmul.f32 %v255_v20, %v232_v22  ;;  %v285_v24 = vsel %vm67_vm1, %v279_v21, 0.0 }
 0x1d2   :  { %286 = vadd.xlane.f32.xlu2 %v285_v24 }
 0x1d3   :  { %v272_v25 = vadd.f32 %v645_v7, %v264_v23 }
 0x1d5   :  { %v881_v26 = vmax.f32 %v272_v25, 0.0 }
 0x1d7   :  { %v280_v27 = vmul.f32 %v881_v26, %v881_v26 }
 0x1d8   :  { %v235_v29 = vpop.f32.mrf.mxu1 }
 0x1d9   :  { %v265_v30 = vmul.f32 %v260_v28, %v235_v29  ;;  %v288_v31 = vsel %vm67_vm1, %v280_v27, 0.0 }
 0x1da   :  { %289 = vadd.xlane.f32.xlu0 %v288_v31 }
 0x1db   :  { %v273_v32 = vadd.f32 %v645_v7, %v265_v30 }
 0x1dd   :  { %v886_v33 = vmax.f32 %v273_v32, 0.0 }
 0x1df   :  { %v281_v34 = vmul.f32 %v886_v33, %v886_v33 }
 0x1e1   :  { %v291_v35 = vsel %vm67_vm1, %v281_v34, 0.0 }
 0x1e2   :  { %292 = vadd.xlane.f32.xlu2 %v291_v35 }
 0x23d   :  { %v284_v36 = vpop.xlane.xlu1 %283 }
 0x23e   :  { %647 = vrsqrt.f32 %v284_v36  ;;  %vm301_vm4 = vcmp.eq.f32.partialorder %v284_v36, inf  ;;  %v304_v53 = vand.u32 2147483648, %v284_v36  ;;  %vm303_vm5 = vcmp.eq.f32.partialorder %v284_v36, 0.0 }
 0x244   :  { %v648_v39 = vpop.eup %647 }
 0x245   :  { %v295_v40 = vmul.f32 %v648_v39, %v284_v36  ;;  %v287_v41 = vpop.xlane.xlu2 %286 }
 0x246   :  { %649 = vrsqrt.f32 %v287_v41  ;;  %vm313_vm6 = vcmp.eq.f32.partialorder %v287_v41, inf  ;;  %v316_v1 = vand.u32 2147483648, %v287_v41  ;;  %vm315_vm7 = vcmp.eq.f32.partialorder %v287_v41, 0.0 }
 0x247   :  { %v296_v43 = vmul.f32 %v648_v39, %v295_v40 }
 0x249   :  { %v297_v45 = vmul.f32 0.5, %v296_v43 }
 0x24b   :  { %v298_v46 = vsub.f32 1.5, %v297_v45 }
 0x24c   :  { %v650_v47 = vpop.eup %649 }
 0x24d   :  { %v299_v48 = vmul.f32 %v648_v39, %v298_v46  ;;  %v307_v49 = vmul.f32 %v650_v47, %v287_v41  ;;  %v290_v50 = vpop.xlane.xlu0 %289 }
 0x24e   :  { %651 = vrsqrt.f32 %v290_v50  ;;  %vm325_vm8 = vcmp.eq.f32.partialorder %v290_v50, inf  ;;  %v328_v17 = vand.u32 2147483648, %v290_v50  ;;  %vm327_vm10 = vcmp.eq.f32.partialorder %v290_v50, 0.0 }
 0x24f   :  { %v300_v51 = vmul.f32 %v299_v48, %v284_v36  ;;  %v308_v52 = vmul.f32 %v650_v47, %v307_v49 }
 0x251   :  { %v302_v54 = vsel %vm301_vm4, %v284_v36, %v300_v51  ;;  %v309_v55 = vmul.f32 0.5, %v308_v52 }
 0x252   :  { %v305_v56 = vsel %vm303_vm5, %v304_v53, %v302_v54 }
 0x253   :  { %v342_v57 = vadd.f32 1.1920929e-07, %v305_v56  ;;  %v310_v58 = vsub.f32 1.5, %v309_v55 }
 0x254   :  { %v652_v59 = vpop.eup %651 }
 0x255   :  { %653 = vrcp.f32 %v342_v57  ;;  %v311_v60 = vmul.f32 %v650_v47, %v310_v58  ;;  %v319_v61 = vmul.f32 %v652_v59, %v290_v50  ;;  %v293_v62 = vpop.xlane.xlu2 %292  ;;  %v357_v16 = vand.u32 2147483648, %v342_v57 }
 0x256   :  { %655 = vrsqrt.f32 %v293_v62  ;;  %v355_v20 = vand.u32 2147483647, %v342_v57  ;;  %vm351_vm11 = vweird.f32 %v342_v57  ;;  %vm337_vm14 = vcmp.eq.f32.partialorder %v293_v62, inf }
 0x257   :  { %v312_v63 = vmul.f32 %v311_v60, %v287_v41  ;;  %v320_v0 = vmul.f32 %v652_v59, %v319_v61  ;;  %v358_v29 = vor.u32 1.1754944e-38, %v357_v16  ;;  %v340_v39 = vand.u32 2147483648, %v293_v62 }
 0x258   :  { %vm356_vm13 = vcmp.eq.f32.partialorder %v355_v20, 8.507059e+37  ;;  %vm339_vm0 = vcmp.eq.f32.partialorder %v293_v62, 0.0 }
 0x259   :  { %v314_v2 = vsel %vm313_vm6, %v287_v41, %v312_v63  ;;  %v321_v3 = vmul.f32 0.5, %v320_v0 }
 0x25a   :  { %v317_v4 = vsel %vm315_vm7, %v316_v1, %v314_v2 }
 0x25b   :  { %v654_v5 = vpop.eup %653  ;;  %v343_v6 = vadd.f32 1.1920929e-07, %v317_v4  ;;  %v322_v7 = vsub.f32 1.5, %v321_v3 }
 0x25c   :  { %v656_v8 = vpop.eup %655  ;;  %v347_v9 = vmul.f32 %v654_v5, %v342_v57  ;;  %vm352_vm9 = vweird.f32 %v654_v5 }
 0x25d   :  { %657 = vrcp.f32 %v343_v6  ;;  %v323_v10 = vmul.f32 %v652_v59, %v322_v7  ;;  %v331_v11 = vmul.f32 %v656_v8, %v293_v62  ;;  %vm353_vm12 = vmor %vm351_vm11, %vm352_vm9  ;;  %v371_v38 = vand.u32 2147483648, %v343_v6 }
 0x25e   :  { %v348_v13 = vsub.f32 1.0, %v347_v9  ;;  %v369_v41 = vand.u32 2147483647, %v343_v6  ;;  %vm365_vm2 = vweird.f32 %v343_v6  ;;  %v710_v7 = vmov 8  }
 0x25f   :  { %v324_v14 = vmul.f32 %v323_v10, %v290_v50  ;;  %v332_v15 = vmul.f32 %v656_v8, %v331_v11  ;;  %v372_v47 = vor.u32 1.1754944e-38, %v371_v38  ;;  %642 = vset.pattern.permute.xlu1 %v710_v7  ;;  %643 = vset.pattern.permute.xlu2 %v710_v7 }
 0x260   :  { %v349_v18 = vmul.f32 %v654_v5, %v348_v13  ;;  %vm370_vm4 = vcmp.eq.f32.partialorder %v369_v41, 8.507059e+37  ;;  %644 = vset.pattern.permute.xlu0 %v710_v7 }
 0x261   :  { %v326_v21 = vsel %vm325_vm8, %v290_v50, %v324_v14  ;;  %v333_v22 = vmul.f32 0.5, %v332_v15 }
 0x262   :  { %v329_v23 = vsel %vm327_vm10, %v328_v17, %v326_v21  ;;  %v350_v24 = vadd.f32 %v654_v5, %v349_v18 }
 0x263   :  { %v658_v25 = vpop.eup %657  ;;  %v344_v27 = vadd.f32 1.1920929e-07, %v329_v23  ;;  %v334_v28 = vsub.f32 1.5, %v333_v22 }
 0x264   :  { %v354_v30 = vsel %vm353_vm12, %v654_v5, %v350_v24  ;;  %v361_v31 = vmul.f32 %v658_v25, %v343_v6  ;;  %vm366_vm15 = vweird.f32 %v658_v25 }
 0x265   :  { %659 = vrcp.f32 %v344_v27  ;;  %v335_v32 = vmul.f32 %v656_v8, %v334_v28  ;;  %v359_v34 = vsel %vm356_vm13, %v358_v29, %v354_v30  ;;  %vm367_vm3 = vmor %vm365_vm2, %vm366_vm15  ;;  %v385_v52 = vand.u32 2147483648, %v344_v27 }
 0x266   :  { %v402_v35 = vmul.f32 %v359_v34, %v871_v12  ;;  %v362_v36 = vsub.f32 1.0, %v361_v31  ;;  %v383_v54 = vand.u32 2147483647, %v344_v27  ;;  %vm379_vm6 = vweird.f32 %v344_v27 }
 0x267   :  { %v336_v37 = vmul.f32 %v335_v32, %v293_v62  ;;  %v386_v57 = vor.u32 1.1754944e-38, %v385_v52 }
 0x268   :  { %619 = vmatmul.msk.f32.vlgmr.msra.gmra.mxu2 %vm67_vm1, %v402_v35  ;;  %v363_v40 = vmul.f32 %v658_v25, %v362_v36  ;;  %vm384_vm8 = vcmp.eq.f32.partialorder %v383_v54, 8.507059e+37 }
 0x269   :  { %v338_v42 = vsel %vm337_vm14, %v293_v62, %v336_v37 }
 0x26a   :  { %v341_v43 = vsel %vm339_vm0, %v340_v39, %v338_v42  ;;  %v364_v44 = vadd.f32 %v658_v25, %v363_v40 }
 0x26b   :  { %v660_v45 = vpop.eup %659  ;;  %v345_v46 = vadd.f32 1.1920929e-07, %v341_v43 }
 0x26c   :  { %v368_v12 = vsel %vm367_vm3, %v658_v25, %v364_v44  ;;  %v375_v48 = vmul.f32 %v660_v45, %v344_v27  ;;  %vm380_vm5 = vweird.f32 %v660_v45 }
 0x26d   :  { %661 = vrcp.f32 %v345_v46  ;;  %v373_v49 = vsel %vm370_vm4, %v372_v47, %v368_v12  ;;  %vm381_vm7 = vmor %vm379_vm6, %vm380_vm5  ;;  %v397_v0 = vand.u32 2147483647, %v345_v46  ;;  %vm393_vm10 = vweird.f32 %v345_v46 }
 0x26e   :  { %v403_v50 = vmul.f32 %v373_v49, %v876_v19  ;;  %v376_v51 = vsub.f32 1.0, %v375_v48  ;;  %v399_v19 = vand.u32 2147483648, %v345_v46 }
 0x26f   :  { %vm398_vm12 = vcmp.eq.f32.partialorder %v397_v0, 8.507059e+37 }
 0x270   :  { %620 = vmatmul.msk.f32.gmra.mxu2 %vm67_vm1, %v403_v50  ;;  %v377_v53 = vmul.f32 %v660_v45, %v376_v51  ;;  %v400_v2 = vor.u32 1.1754944e-38, %v399_v19 }
 0x272   :  { %v378_v55 = vadd.f32 %v660_v45, %v377_v53 }
 0x273   :  { %v662_v56 = vpop.eup %661 }
 0x274   :  { %v382_v58 = vsel %vm381_vm7, %v660_v45, %v378_v55  ;;  %v389_v59 = vmul.f32 %v662_v56, %v345_v46  ;;  %vm394_vm9 = vweird.f32 %v662_v56 }
 0x275   :  { %v387_v60 = vsel %vm384_vm8, %v386_v57, %v382_v58  ;;  %vm395_vm11 = vmor %vm393_vm10, %vm394_vm9 }
 0x276   :  { %v404_v61 = vmul.f32 %v387_v60, %v881_v26  ;;  %v390_v62 = vsub.f32 1.0, %v389_v59  ;;  %v646_v26 = vld [vmem:[%s944_s7] ss:$0 sm:$0xff]  ;;  %s712_s7 = smov [#allocation2]  }
 0x277   :  { %s592_s25 = sshll.u32 %s712_s7, 4  ;;  %s593_s25 = int_to_ptr.vmem [resolvable:$true] %s592_s25 }
 0x278   :  { %621 = vmatmul.msk.f32.gmra.mxu2 %vm67_vm1, %v404_v61  ;;  %v391_v63 = vmul.f32 %v662_v56, %v390_v62 }
 0x27a   :  { %v392_v1 = vadd.f32 %v662_v56, %v391_v63 }
 0x27c   :  { %v396_v3 = vsel %vm395_vm11, %v662_v56, %v392_v1 }
 0x27d   :  { %v401_v4 = vsel %vm398_vm12, %v400_v2, %v396_v3 }
 0x27e   :  { %v405_v5 = vmul.f32 %v401_v4, %v886_v33 }
 0x280   :  { %622 = vmatmul.msk.f32.gmra.mxu2 %vm67_vm1, %v405_v5 }
 0x2eb   :  { %v443_v6 = vpop.f32.mrf.mxu2 }
 0x2ec   :  { %v914_v8 = vadd.f32 %v646_v26, %v443_v6 }
 0x2ee   :  { %v623_v9 = vmul.f32 -1.442695, %v914_v8 }
 0x2f0   :  { %663 = vpow2.f32 %v623_v9 }
 0x2f3   :  { %v446_v10 = vpop.f32.mrf.mxu2 }
 0x2f4   :  { %v917_v11 = vadd.f32 %v646_v26, %v446_v10 }
 0x2f6   :  { %v664_v33 = vpop.eup %663  ;;  %v624_v13 = vmul.f32 -1.442695, %v917_v11 }
 0x2f7   :  { %v467_v14 = vadd.f32 1.0, %v664_v33  ;;  %v711_v33 = vmov 16.0  }
 0x2f8   :  { %665 = vpow2.f32 %v624_v13 }
 0x2f9   :  { %667 = vrcp.f32 %v467_v14  ;;  %v482_v25 = vand.u32 2147483648, %v467_v14  ;;  %v480_v29 = vand.u32 2147483647, %v467_v14  ;;  %vm476_vm13 = vweird.f32 %v467_v14 }
 0x2fb   :  { %v449_v15 = vpop.f32.mrf.mxu2  ;;  %v483_v36 = vor.u32 1.1754944e-38, %v482_v25  ;;  %vm481_vm15 = vcmp.eq.f32.partialorder %v480_v29, 8.507059e+37 }
 0x2fc   :  { %v920_v16 = vadd.f32 %v646_v26, %v449_v15 }
 0x2fe   :  { %v666_v17 = vpop.eup %665  ;;  %v625_v18 = vmul.f32 -1.442695, %v920_v16 }
 0x2ff   :  { %v668_v20 = vpop.eup %667  ;;  %v468_v21 = vadd.f32 1.0, %v666_v17 }
 0x300   :  { %669 = vpow2.f32 %v625_v18  ;;  %v472_v22 = vmul.f32 %v668_v20, %v467_v14  ;;  %vm477_vm1 = vweird.f32 %v668_v20 }
 0x301   :  { %671 = vrcp.f32 %v468_v21  ;;  %vm478_vm14 = vmor %vm476_vm13, %vm477_vm1  ;;  %v497_v41 = vand.u32 2147483648, %v468_v21  ;;  %v495_v43 = vand.u32 2147483647, %v468_v21  ;;  %vm491_vm2 = vweird.f32 %v468_v21 }
 0x302   :  { %v473_v23 = vsub.f32 1.0, %v472_v22  ;;  %vm555_vm1 = vcmask 64512  }
 0x303   :  { %v452_v24 = vpop.f32.mrf.mxu2  ;;  %v498_v12 = vor.u32 1.1754944e-38, %v497_v41  ;;  %vm496_vm4 = vcmp.eq.f32.partialorder %v495_v43, 8.507059e+37 }
 0x304   :  { %v923_v27 = vadd.f32 %v646_v26, %v452_v24  ;;  %v474_v28 = vmul.f32 %v668_v20, %v473_v23 }
 0x306   :  { %v670_v30 = vpop.eup %669  ;;  %v626_v31 = vmul.f32 -1.442695, %v923_v27  ;;  %v475_v32 = vadd.f32 %v668_v20, %v474_v28 }
 0x307   :  { %v672_v34 = vpop.eup %671  ;;  %v469_v35 = vadd.f32 1.0, %v670_v30 }
 0x308   :  { %673 = vpow2.f32 %v626_v31  ;;  %v479_v37 = vsel %vm478_vm14, %v668_v20, %v475_v32  ;;  %v487_v38 = vmul.f32 %v672_v34, %v468_v21  ;;  %vm492_vm0 = vweird.f32 %v672_v34 }
 0x309   :  { %675 = vrcp.f32 %v469_v35  ;;  %v484_v39 = vsel %vm481_vm15, %v483_v36, %v479_v37  ;;  %vm493_vm3 = vmor %vm491_vm2, %vm492_vm0  ;;  %v512_v52 = vand.u32 2147483648, %v469_v35  ;;  %v510_v54 = vand.u32 2147483647, %v469_v35 }
 0x30a   :  { %533 = vperm.xlu1 %642, %v484_v39   ;;  %v488_v40 = vsub.f32 1.0, %v487_v38  ;;  %vm506_vm6 = vweird.f32 %v469_v35  ;;  %vm583_vm14 = vcmask 1040384   ;;  %vm585_vm15 = vcmask 58368  }
 0x30b   :  { %v513_v57 = vor.u32 1.1754944e-38, %v512_v52  ;;  %vm511_vm8 = vcmp.eq.f32.partialorder %v510_v54, 8.507059e+37 }
 0x30c   :  { %v489_v42 = vmul.f32 %v672_v34, %v488_v40 }
 0x30e   :  { %v674_v44 = vpop.eup %673  ;;  %v490_v45 = vadd.f32 %v672_v34, %v489_v42 }
 0x30f   :  { %v676_v46 = vpop.eup %675  ;;  %v470_v47 = vadd.f32 1.0, %v674_v44 }
 0x310   :  { %v494_v48 = vsel %vm493_vm3, %v672_v34, %v490_v45  ;;  %v502_v49 = vmul.f32 %v676_v46, %v469_v35  ;;  %vm507_vm5 = vweird.f32 %v676_v46 }
 0x311   :  { %677 = vrcp.f32 %v470_v47  ;;  %v499_v50 = vsel %vm496_vm4, %v498_v12, %v494_v48  ;;  %vm508_vm7 = vmor %vm506_vm6, %vm507_vm5  ;;  %v527_v62 = vand.u32 2147483648, %v470_v47  ;;  %v525_v63 = vand.u32 2147483647, %v470_v47 }
 0x312   :  { %538 = vperm.xlu2 %643, %v499_v50   ;;  %v503_v51 = vsub.f32 1.0, %v502_v49  ;;  %vm521_vm10 = vweird.f32 %v470_v47  ;;  %679 = vrcp.f32 %v711_v33 }
 0x313   :  { %v528_v1 = vor.u32 1.1754944e-38, %v527_v62  ;;  %vm526_vm12 = vcmp.eq.f32.partialorder %v525_v63, 8.507059e+37 }
 0x314   :  { %v504_v53 = vmul.f32 %v676_v46, %v503_v51 }
 0x316   :  { %v505_v55 = vadd.f32 %v676_v46, %v504_v53 }
 0x317   :  { %v678_v56 = vpop.eup %677 }
 0x318   :  { %v509_v58 = vsel %vm508_vm7, %v676_v46, %v505_v55  ;;  %v517_v59 = vmul.f32 %v678_v56, %v470_v47  ;;  %vm522_vm9 = vweird.f32 %v678_v56  ;;  %v680_v14 = vpop.eup %679 }
 0x319   :  { %v514_v60 = vsel %vm511_vm8, %v513_v57, %v509_v58  ;;  %vm523_vm11 = vmor %vm521_vm10, %vm522_vm9  ;;  %v566_v20 = vmul.f32 16.0, %v680_v14  ;;  %vm570_vm13 = vweird.f32 %v680_v14 }
 0x31a   :  { %543 = vperm.xlu0 %644, %v514_v60   ;;  %v518_v61 = vsub.f32 1.0, %v517_v59 }
 0x31b   :  { %v567_v24 = vsub.f32 1.0, %v566_v20 }
 0x31c   :  { %v519_v19 = vmul.f32 %v678_v56, %v518_v61 }
 0x31d   :  { %v568_v30 = vmul.f32 %v680_v14, %v567_v24 }
 0x31e   :  { %v520_v0 = vadd.f32 %v678_v56, %v519_v19 }
 0x31f   :  { %v569_v35 = vadd.f32 %v680_v14, %v568_v30 }
 0x320   :  { %v524_v2 = vsel %vm523_vm11, %v678_v56, %v520_v0 }
 0x321   :  { %v529_v3 = vsel %vm526_vm12, %v528_v1, %v524_v2  ;;  %v571_v38 = vsel %vm570_vm13, %v680_v14, %v569_v35 }
 0x322   :  { %548 = vperm.xlu1 %642, %v529_v3  }
 0x36c   :  { %v539_v5 = vpop.permute.xlu2 %538 }
 0x36d   :  { %v552_v6 = vmul.f32 %v539_v5, %v917_v11 }
 0x36f   :  { %v557_v9 = vsel %vm555_vm1, %v552_v6, 0.0 }
 0x37c   :  { %v534_v4 = vpop.permute.xlu1 %533 }
 0x37d   :  { %v551_v26 = vmul.f32 %v534_v4, %v914_v8 }
 0x37f   :  { %v556_v7 = vsel %vm555_vm1, %v551_v26, 0.0 }
 0x380   :  { %v558_v10 = vadd.f32 %v557_v9, %v556_v7 }
 0x382   :  { %v559_v13 = vrot.slane %v558_v10, 4 }
 0x384   :  { %v560_v17 = vadd.f32 %v559_v13, %v558_v10 }
 0x386   :  { %v561_v22 = vrot.slane %v560_v17, 2 }
 0x388   :  { %v562_v28 = vadd.f32 %v561_v22, %v560_v17 }
 0x38a   :  { %v563_v32 = vrot.slane %v562_v28, 1 }
 0x38c   :  { %v544_v15 = vpop.permute.xlu0 %543 }
 0x38d   :  { %v553_v18 = vmul.f32 %v544_v15, %v920_v16  ;;  %v564_v16 = vadd.f32 %v563_v32, %v562_v28 }
 0x38f   :  { %v573_v11 = vsel %vm555_vm1, %v553_v18, 0.0  ;;  %v572_v39 = vmul.f32 %v571_v38, %v564_v16 }
 0x394   :  { %v549_v21 = vpop.permute.xlu1 %548 }
 0x395   :  { %v554_v8 = vmul.f32 %v549_v21, %v923_v27 }
 0x397   :  { %v574_v23 = vsel %vm555_vm1, %v554_v8, 0.0 }
 0x398   :  { %v575_v25 = vadd.f32 %v574_v23, %v573_v11 }
 0x39a   :  { %v576_v29 = vrot.slane %v575_v25, 4 }
 0x39c   :  { %v577_v31 = vadd.f32 %v576_v29, %v575_v25 }
 0x39e   :  { %v578_v34 = vrot.slane %v577_v31, 2 }
 0x3a0   :  { %v579_v36 = vadd.f32 %v578_v34, %v577_v31 }
 0x3a2   :  { %v580_v37 = vrot.slane %v579_v36, 1 }
 0x3a4   :  { %v581_v27 = vadd.f32 %v580_v37, %v579_v36 }
 0x3a6   :  { %v582_v40 = vmul.f32 %v581_v27, %v571_v38 }
 0x3a8   :  { %v584_v41 = vsel %vm583_vm14, %v572_v39, %v582_v40 }
 0x3a9   :  { %586 = vst.msk [vmem:[#allocation2] sm:$0x3] %vm585_vm15, %v584_v41 }
 0x3aa   :  { %597 = dma.vmem_to_hbm [thread:$0]  %s593_s25, 32, %s595_s27, [#allocation3]  }
 0x3ab   :  { %705 = dma.done.wait [#allocation3], 32  }
 0x3ac   :  { %706 = vsyncadd [#allocation3], 4294967264 }
 0x3ad   :  { %602 = vsyncpa [#allocation3], 1 }

</bundles_post_ra>
